<compile_context>
chip_gen: v7x
topology: tpu7x:2x2x1
jax: 0.10.0
libtpu: 0.0.40
codegen_flags: <defaults>
</compile_context>

<pallas_src>
import jax
import jax.numpy as jnp
from jax.experimental import pallas as pl
from jax.experimental.pallas import tpu as pltpu

# ----------------------------- configuration -------------------------------
DIM = 32              # input feature dim
HIDDEN = 64           # hidden_dim of the PyTorch module
EMBED = 16            # embed_dim (output dim) of the PyTorch module
LAYERS = 2            # number of hidden Linear(hidden, hidden) blocks
ACTIVATION = "relu"   # 'relu' or 'lrelu'
BATCH = 16

HIDDEN_P = 128        # lane-padded hidden width (zero padding, exact)
EMBED_P = 128         # lane-padded output width (zero padding, exact)
MAX_TILE_M = 256      # max batch rows per grid step (fills MXU M on v6e/v7x)
MXU_DTYPE = jnp.bfloat16   # matmul operand dtype; accumulation stays f32


def _round_up(x, m):
    return (x + m - 1) // m * m


def _act(x):
    if ACTIVATION == "relu":
        return jnp.maximum(x, 0.0)
    # torch.nn.LeakyReLU default negative_slope = 0.01
    return jnp.where(x > 0.0, x, 0.01 * x)


# ------------------------------- kernel ------------------------------------
def entropic_critic_kernel(x_ref, w0_ref, b0_ref, wh_ref, bh_ref,
                           wo_ref, bo_ref, o_ref):
    # Hoist bias loads out of the unrolled hidden loop (no per-layer reload).
    b0 = b0_ref[...]            # (1, HIDDEN_P)  f32
    bh = bh_ref[...]            # (LAYERS, 1, HIDDEN_P)  f32
    bo = bo_ref[...]            # (1, EMBED_P)   f32

    x = x_ref[...].astype(MXU_DTYPE)                       # (tile_m, DIM)
    h = jnp.dot(x, w0_ref[...],
                preferred_element_type=jnp.float32) + b0   # f32 accum
    h = _act(h)

    # Hidden stack: statically unrolled (LAYERS is compile-time constant).
    for l in range(LAYERS):
        h = jnp.dot(h.astype(MXU_DTYPE), wh_ref[l],
                    preferred_element_type=jnp.float32) + bh[l]
        h = _act(h)

    out = jnp.dot(h.astype(MXU_DTYPE), wo_ref[...],
                  preferred_element_type=jnp.float32) + bo
    o_ref[...] = out.astype(o_ref.dtype)                   # lane-dense store


# ------------------------------ wrapper -------------------------------------
@jax.jit
def entropic_critic(x, w0p, b0p, whp, bhp, wop, bop):
    m = x.shape[0]
    if m % 8 == 0:
        tile_m = min(MAX_TILE_M, m)
    else:
        tile_m = min(MAX_TILE_M, _round_up(m, 8))
    grid = (pl.cdiv(m, tile_m),)

    full = lambda shape: pl.BlockSpec(shape, lambda i: (0,) * len(shape))

    out = pl.pallas_call(
        entropic_critic_kernel,
        out_shape=jax.ShapeDtypeStruct((m, EMBED_P), x.dtype),
        grid=grid,
        in_specs=[
            pl.BlockSpec((tile_m, DIM), lambda i: (i, 0)),   # x tile
            full((DIM, HIDDEN_P)),                           # w0
            full((1, HIDDEN_P)),                             # b0
            full((LAYERS, HIDDEN_P, HIDDEN_P)),              # hidden Ws
            full((LAYERS, 1, HIDDEN_P)),                     # hidden bs
            full((HIDDEN_P, EMBED_P)),                       # w_out
            full((1, EMBED_P)),                              # b_out
        ],
        out_specs=pl.BlockSpec((tile_m, EMBED_P), lambda i: (i, 0)),
        compiler_params=pltpu.CompilerParams(
            dimension_semantics=("parallel",)),
    )(x, w0p, b0p, whp, bhp, wop, bop)
    # Strip the zero lane padding (exactly zero by construction).
    return out[:, :EMBED]


# ------------------------- parameter construction ---------------------------
def init_params(key):
    """Deterministic init mimicking torch.nn.Linear's U(-1/sqrt(fan_in), ...)."""
    ks = jax.random.split(key, 3)

    def lin(k, fan_in, fan_out):
        bound = 1.0 / jnp.sqrt(float(fan_in))
        kw, kb = jax.random.split(k)
        w = jax.random.uniform(kw, (fan_in, fan_out), jnp.float32, -bound, bound)
        b = jax.random.uniform(kb, (1, fan_out), jnp.float32, -bound, bound)
        return w, b

    w0, b0 = lin(ks[0], DIM, HIDDEN)

    whs, bhs = [], []
    hk = jax.random.split(ks[1], LAYERS)
    for l in range(LAYERS):
        w, b = lin(hk[l], HIDDEN, HIDDEN)
        whs.append(w)
        bhs.append(b)
    wh = jnp.stack(whs, axis=0)                 # (LAYERS, HIDDEN, HIDDEN)
    bh = jnp.stack(bhs, axis=0)                 # (LAYERS, 1, HIDDEN)

    wo, bo = lin(ks[2], HIDDEN, EMBED)
    return w0, b0, wh, bh, wo, bo


def prepare_params(w0, b0, wh, bh, wo, bo):
    """Zero-pad hidden/output widths to 128 lanes; cast weights to MXU dtype.

    Zero padding preserves the forward pass exactly: padded hidden units get
    bias 0 and weight 0 -> activation(0) = 0 -> contribute 0 downstream; padded
    output columns are 0 and are sliced off in the wrapper.
    """
    w0p = jnp.zeros((DIM, HIDDEN_P), jnp.float32).at[:, :HIDDEN].set(w0)
    b0p = jnp.zeros((1, HIDDEN_P), jnp.float32).at[:, :HIDDEN].set(b0)
    whp = (jnp.zeros((LAYERS, HIDDEN_P, HIDDEN_P), jnp.float32)
           .at[:, :HIDDEN, :HIDDEN].set(wh))
    bhp = (jnp.zeros((LAYERS, 1, HIDDEN_P), jnp.float32)
           .at[:, :, :HIDDEN].set(bh))
    wop = (jnp.zeros((HIDDEN_P, EMBED_P), jnp.float32)
           .at[:HIDDEN, :EMBED].set(wo))
    bop = jnp.zeros((1, EMBED_P), jnp.float32).at[:, :EMBED].set(bo)
    return (w0p.astype(MXU_DTYPE), b0p, whp.astype(MXU_DTYPE), bhp,
            wop.astype(MXU_DTYPE), bop)


# ------------------------------ references ----------------------------------
def reference_forward_mxu(x, w0, b0, wh, bh, wo, bo):
    """Pure-JAX reference with the same operand precision as the kernel."""
    def dot(a, b):
        return jnp.dot(a.astype(MXU_DTYPE), b.astype(MXU_DTYPE),
                       preferred_element_type=jnp.float32)
    h = _act(dot(x, w0) + b0)
    for l in range(LAYERS):
        h = _act(dot(h, wh[l]) + bh[l])
    return dot(h, wo) + bo


def reference_forward_f32(x, w0, b0, wh, bh, wo, bo):
    """Full-f32 reference matching the PyTorch module semantics."""
    h = _act(x @ w0 + b0)
    for l in range(LAYERS):
        h = _act(h @ wh[l] + bh[l])
    return h @ wo + bo


# --------------------------------- main --------------------------------------
if __name__ == "__main__":
    key = jax.random.PRNGKey(0)
    kx, kp = jax.random.split(key)

    x = jax.random.normal(kx, (BATCH, DIM), dtype=jnp.float32)
    params = init_params(kp)
    padded = prepare_params(*params)

    out = entropic_critic(x, *padded)
    out = jax.block_until_ready(out)
    assert out.shape == (BATCH, EMBED)

    # Tight check vs reference at the same (bf16-operand, f32-accum) precision.
    ref = reference_forward_mxu(x, *params)
    assert jnp.allclose(out, ref, atol=1e-4, rtol=1e-4), "mismatch vs MXU ref"

    # Loose check vs the exact f32 PyTorch-equivalent forward.
    ref32 = reference_forward_f32(x, *params)
    assert jnp.allclose(out, ref32, atol=5e-2, rtol=5e-2), "mismatch vs f32 ref"

    print("KERNEL_OK")
</pallas_src>

<mosaic_0001>
module attributes {stable_mosaic.version = 11 : i64} {
  func.func @entropic_critic_kernel(%arg0: i32, %arg1: memref<16x32xf32, #tpu.memory_space<vmem>>, %arg2: memref<32x128xbf16, #tpu.memory_space<vmem>>, %arg3: memref<1x128xf32, #tpu.memory_space<vmem>>, %arg4: memref<2x128x128xbf16, #tpu.memory_space<vmem>>, %arg5: memref<2x1x128xf32, #tpu.memory_space<vmem>>, %arg6: memref<128x128xbf16, #tpu.memory_space<vmem>>, %arg7: memref<1x128xf32, #tpu.memory_space<vmem>>, %arg8: memref<16x128xf32, #tpu.memory_space<vmem>>) attributes {dimension_semantics = [#tpu.dimension_semantics<parallel>], iteration_bounds = array<i64: 1>, scalar_prefetch = 0 : i64, scratch_operands = 0 : i64, tpu.core_type = #tpu.core_type<tc>, window_params = [{transform_indices = @transform_0, window_bounds = array<i64: 16, 32>}, {pipeline_mode = #tpu.pipeline_mode<synchronous>, transform_indices = @transform_1, window_bounds = array<i64: 32, 128>}, {pipeline_mode = #tpu.pipeline_mode<synchronous>, transform_indices = @transform_2, window_bounds = array<i64: 1, 128>}, {pipeline_mode = #tpu.pipeline_mode<synchronous>, transform_indices = @transform_3, window_bounds = array<i64: 2, 128, 128>}, {pipeline_mode = #tpu.pipeline_mode<synchronous>, transform_indices = @transform_4, window_bounds = array<i64: 2, 1, 128>}, {pipeline_mode = #tpu.pipeline_mode<synchronous>, transform_indices = @transform_5, window_bounds = array<i64: 128, 128>}, {pipeline_mode = #tpu.pipeline_mode<synchronous>, transform_indices = @transform_6, window_bounds = array<i64: 1, 128>}, {transform_indices = @transform_7, window_bounds = array<i64: 16, 128>}]} {
    %c0 = arith.constant 0 : index
    %c0_0 = arith.constant 0 : index
    %0 = vector.load %arg3[%c0, %c0_0] : memref<1x128xf32, #tpu.memory_space<vmem>>, vector<1x128xf32>
    %c0_1 = arith.constant 0 : index
    %c0_2 = arith.constant 0 : index
    %c0_3 = arith.constant 0 : index
    %1 = vector.load %arg5[%c0_1, %c0_2, %c0_3] : memref<2x1x128xf32, #tpu.memory_space<vmem>>, vector<2x1x128xf32>
    %c0_4 = arith.constant 0 : index
    %c0_5 = arith.constant 0 : index
    %2 = vector.load %arg7[%c0_4, %c0_5] : memref<1x128xf32, #tpu.memory_space<vmem>>, vector<1x128xf32>
    %c0_6 = arith.constant 0 : index
    %c0_7 = arith.constant 0 : index
    %3 = vector.load %arg1[%c0_6, %c0_7] : memref<16x32xf32, #tpu.memory_space<vmem>>, vector<16x32xf32>
    %4 = arith.truncf %3 : vector<16x32xf32> to vector<16x32xbf16>
    %c0_8 = arith.constant 0 : index
    %c0_9 = arith.constant 0 : index
    %5 = vector.load %arg2[%c0_8, %c0_9] : memref<32x128xbf16, #tpu.memory_space<vmem>>, vector<32x128xbf16>
    %cst = arith.constant dense<0.000000e+00> : vector<16x128xf32>
    %6 = tpu.matmul %4, %5, %cst {dimension_numbers = #tpu.dot_dimension_numbers<[1], [0], [0], [1], [0, 0, 1, 1], [], []>} : vector<16x32xbf16>, vector<32x128xbf16>, vector<16x128xf32> -> vector<16x128xf32>
    %7 = vector.broadcast %0 : vector<1x128xf32> to vector<16x128xf32>
    %8 = arith.addf %6, %7 : vector<16x128xf32>
    %cst_10 = arith.constant 0.000000e+00 : f32
    %9 = vector.broadcast %cst_10 : f32 to vector<16x128xf32>
    %10 = arith.maximumf %8, %9 : vector<16x128xf32>
    %11 = arith.truncf %10 : vector<16x128xf32> to vector<16x128xbf16>
    %c0_11 = arith.constant 0 : index
    %c0_12 = arith.constant 0 : index
    %c0_13 = arith.constant 0 : index
    %12 = vector.load %arg4[%c0_11, %c0_12, %c0_13] : memref<2x128x128xbf16, #tpu.memory_space<vmem>>, vector<1x128x128xbf16>
    %13 = vector.shape_cast %12 : vector<1x128x128xbf16> to vector<128x128xbf16>
    %cst_14 = arith.constant dense<0.000000e+00> : vector<16x128xf32>
    %14 = tpu.matmul %11, %13, %cst_14 {dimension_numbers = #tpu.dot_dimension_numbers<[1], [0], [0], [1], [0, 0, 1, 1], [], []>} : vector<16x128xbf16>, vector<128x128xbf16>, vector<16x128xf32> -> vector<16x128xf32>
    %15 = vector.extract_strided_slice %1 {offsets = [0, 0, 0], sizes = [1, 1, 128], strides = [1, 1, 1]} : vector<2x1x128xf32> to vector<1x1x128xf32>
    %16 = vector.shape_cast %15 : vector<1x1x128xf32> to vector<1x128xf32>
    %17 = vector.broadcast %16 : vector<1x128xf32> to vector<16x128xf32>
    %18 = arith.addf %14, %17 : vector<16x128xf32>
    %cst_15 = arith.constant 0.000000e+00 : f32
    %19 = vector.broadcast %cst_15 : f32 to vector<16x128xf32>
    %20 = arith.maximumf %18, %19 : vector<16x128xf32>
    %21 = arith.truncf %20 : vector<16x128xf32> to vector<16x128xbf16>
    %c1 = arith.constant 1 : index
    %c0_16 = arith.constant 0 : index
    %c0_17 = arith.constant 0 : index
    %22 = vector.load %arg4[%c1, %c0_16, %c0_17] : memref<2x128x128xbf16, #tpu.memory_space<vmem>>, vector<1x128x128xbf16>
    %23 = vector.shape_cast %22 : vector<1x128x128xbf16> to vector<128x128xbf16>
    %cst_18 = arith.constant dense<0.000000e+00> : vector<16x128xf32>
    %24 = tpu.matmul %21, %23, %cst_18 {dimension_numbers = #tpu.dot_dimension_numbers<[1], [0], [0], [1], [0, 0, 1, 1], [], []>} : vector<16x128xbf16>, vector<128x128xbf16>, vector<16x128xf32> -> vector<16x128xf32>
    %25 = vector.extract_strided_slice %1 {offsets = [1, 0, 0], sizes = [1, 1, 128], strides = [1, 1, 1]} : vector<2x1x128xf32> to vector<1x1x128xf32>
    %26 = vector.shape_cast %25 : vector<1x1x128xf32> to vector<1x128xf32>
    %27 = vector.broadcast %26 : vector<1x128xf32> to vector<16x128xf32>
    %28 = arith.addf %24, %27 : vector<16x128xf32>
    %cst_19 = arith.constant 0.000000e+00 : f32
    %29 = vector.broadcast %cst_19 : f32 to vector<16x128xf32>
    %30 = arith.maximumf %28, %29 : vector<16x128xf32>
    %31 = arith.truncf %30 : vector<16x128xf32> to vector<16x128xbf16>
    %c0_20 = arith.constant 0 : index
    %c0_21 = arith.constant 0 : index
    %32 = vector.load %arg6[%c0_20, %c0_21] : memref<128x128xbf16, #tpu.memory_space<vmem>>, vector<128x128xbf16>
    %cst_22 = arith.constant dense<0.000000e+00> : vector<16x128xf32>
    %33 = tpu.matmul %31, %32, %cst_22 {dimension_numbers = #tpu.dot_dimension_numbers<[1], [0], [0], [1], [0, 0, 1, 1], [], []>} : vector<16x128xbf16>, vector<128x128xbf16>, vector<16x128xf32> -> vector<16x128xf32>
    %34 = vector.broadcast %2 : vector<1x128xf32> to vector<16x128xf32>
    %35 = arith.addf %33, %34 : vector<16x128xf32>
    %c0_23 = arith.constant 0 : index
    %c0_24 = arith.constant 0 : index
    %36 = vector.load %arg8[%c0_23, %c0_24] : memref<16x128xf32, #tpu.memory_space<vmem>>, vector<16x128xf32>
    tpu.vector_store %arg8[%c0_23, %c0_24], %35 {strides = array<i32>} : memref<16x128xf32, #tpu.memory_space<vmem>>, vector<16x128xf32>,
    return
  }
  func.func @transform_0(%arg0: i32) -> (i32, i32) {
    %c0_i32 = arith.constant 0 : i32
    %c0_i32_0 = arith.constant 0 : i32
    return %arg0, %c0_i32 : i32, i32
  }
  func.func @transform_1(%arg0: i32) -> (i32, i32) {
    %c0_i32 = arith.constant 0 : i32
    %c0_i32_0 = arith.constant 0 : i32
    %c0_i32_1 = arith.constant 0 : i32
    return %c0_i32, %c0_i32_0 : i32, i32
  }
  func.func @transform_2(%arg0: i32) -> (i32, i32) {
    %c0_i32 = arith.constant 0 : i32
    %c0_i32_0 = arith.constant 0 : i32
    %c0_i32_1 = arith.constant 0 : i32
    return %c0_i32, %c0_i32_0 : i32, i32
  }
  func.func @transform_3(%arg0: i32) -> (i32, i32, i32) {
    %c0_i32 = arith.constant 0 : i32
    %c0_i32_0 = arith.constant 0 : i32
    %c0_i32_1 = arith.constant 0 : i32
    %c0_i32_2 = arith.constant 0 : i32
    return %c0_i32, %c0_i32_0, %c0_i32_1 : i32, i32, i32
  }
  func.func @transform_4(%arg0: i32) -> (i32, i32, i32) {
    %c0_i32 = arith.constant 0 : i32
    %c0_i32_0 = arith.constant 0 : i32
    %c0_i32_1 = arith.constant 0 : i32
    %c0_i32_2 = arith.constant 0 : i32
    return %c0_i32, %c0_i32_0, %c0_i32_1 : i32, i32, i32
  }
  func.func @transform_5(%arg0: i32) -> (i32, i32) {
    %c0_i32 = arith.constant 0 : i32
    %c0_i32_0 = arith.constant 0 : i32
    %c0_i32_1 = arith.constant 0 : i32
    return %c0_i32, %c0_i32_0 : i32, i32
  }
  func.func @transform_6(%arg0: i32) -> (i32, i32) {
    %c0_i32 = arith.constant 0 : i32
    %c0_i32_0 = arith.constant 0 : i32
    %c0_i32_1 = arith.constant 0 : i32
    return %c0_i32, %c0_i32_0 : i32, i32
  }
  func.func @transform_7(%arg0: i32) -> (i32, i32) {
    %c0_i32 = arith.constant 0 : i32
    %c0_i32_0 = arith.constant 0 : i32
    return %arg0, %c0_i32 : i32, i32
  }
}

</mosaic_0001>

<bundles_post_ra>
// kernel: entropic_critic.1
= control target key start
LH: loop header
LB: loop body
LE: loop exit
PB: predicated region body
PF: predicated region fallthrough
CT: control target
= control target key end

     0   :  { %12 = vsyncpa [#allocation3], 0  ;;  %s984_s0 = inlined_call_operand.hbm [shape: f32[16,32], index: 0, kind: input, shape index: {}]   ;;  %s985_s1 = inlined_call_operand.hbm [shape: bf16[32,128], index: 1, kind: input, shape index: {}]   ;;  %s986_s2 = inlined_call_operand.vmem [shape: f32[1,128], index: 2, kind: input, shape index: {}]   ;;  %s987_s3 = inlined_call_operand.hbm [shape: bf16[2,128,128], index: 3, kind: input, shape index: {}]   ;;  %s988_s4 = inlined_call_operand.vmem [shape: f32[2,1,128], index: 4, kind: input, shape index: {}]   ;;  %s989_s5 = inlined_call_operand.hbm [shape: bf16[128,128], index: 5, kind: input, shape index: {}]   ;;  %s990_s6 = inlined_call_operand.vmem [shape: f32[1,128], index: 6, kind: input, shape index: {}]   ;;  %s991_s7 = inlined_call_operand.hbm [shape: f32[16,128], index: 7, kind: output, shape index: {}]  }
   0x1   :  { %13 = vsyncpa [#allocation6], 0 }
   0x2   :  { %14 = vsyncpa [#allocation9], 0 }
   0x3   :  { %15 = vsyncpa [#allocation4], 0  ;;  %s805_s24 = smov [#allocation5]   ;;  %s687_s28 = scalar_lea.hbm %s985_s1, 256 }
   0x4   :  { %s33_s25 = sshll.u32 %s805_s24, 4  ;;  %p688_p0 = scmp.ne.s32.totalorder %s985_s1, %s687_s28  ;;  %s34_s25 = int_to_ptr.vmem [resolvable:$true] %s33_s25 }
   0x5   :  { %p691_p1 = scmp.lt.u32.totalorder %s687_s28, %s985_s1 }
   0x7   :  { %p693_p2 = pnand %p691_p1, %p688_p0 }
   0x9   :  { %696 = shalt.err (!%p693_p2)
}
   0xa   :  { %s697_s10 = scalar_lea.vmem %s34_s25, 256  ;;  %p702_p4 = scmp.lt.s32.totalorder %s34_s25, %s34_s25 }
   0xb   :  { %p698_p3 = scmp.ne.s32.totalorder %s34_s25, %s697_s10  ;;  %p703_p5 = scmp.lt.s32.totalorder %s697_s10, %s697_s10 }
   0xd   :  { %p704_p6 = por %p703_p5, %p702_p4 }
   0xf   :  { %p705_p7 = pnand %p704_p6, %p698_p3 }
  0x11   :  { %708 = shalt.err (!%p705_p7)
}
  0x12   :  { %s806_s11 = smov 64   ;;  %s807_s12 = smov 4  }
  0x13   :  { %39 = dma.hbm_to_vmem [thread:$0]  %s985_s1, 256, %s34_s25, [#allocation6], %s806_s11, %s806_s11, %s807_s12  }
  0x14   :  { %s808_s15 = smov [#allocation2]   ;;  %s709_s19 = scalar_lea.hbm %s984_s0, 256 }
  0x15   :  { %s21_s16 = sshll.u32 %s808_s15, 4  ;;  %p710_p8 = scmp.ne.s32.totalorder %s984_s0, %s709_s19  ;;  %s22_s16 = int_to_ptr.vmem [resolvable:$true] %s21_s16 }
  0x16   :  { %p713_p9 = scmp.lt.u32.totalorder %s709_s19, %s984_s0 }
  0x18   :  { %p715_p10 = pnand %p713_p9, %p710_p8 }
  0x1a   :  { %718 = shalt.err (!%p715_p10)
}
  0x1b   :  { %s719_s24 = scalar_lea.vmem %s22_s16, 256  ;;  %p724_p12 = scmp.lt.s32.totalorder %s22_s16, %s22_s16 }
  0x1c   :  { %p720_p11 = scmp.ne.s32.totalorder %s22_s16, %s719_s24  ;;  %p725_p13 = scmp.lt.s32.totalorder %s719_s24, %s719_s24 }
  0x1e   :  { %p726_p0 = por %p725_p13, %p724_p12 }
  0x20   :  { %p727_p1 = pnand %p726_p0, %p720_p11 }
  0x22   :  { %730 = shalt.err (!%p727_p1)
}
  0x23   :  { %s809_s1 = smov 128   ;;  %s810_s25 = smov 8  }
  0x24   :  { %27 = dma.hbm_to_vmem [thread:$0]  %s984_s0, 256, %s22_s16, [#allocation3], %s809_s1, %s809_s1, %s810_s25  }
  0x25   :  { %s811_s28 = smov [#allocation7]   ;;  %s812_s30 = smov [#allocation8]  }
  0x26   :  { %s47_s29 = sshll.u32 %s811_s28, 4  ;;  %s61_s8 = sshll.u32 %s812_s30, 4  ;;  %s48_s29 = int_to_ptr.vmem [resolvable:$true] %s47_s29  ;;  %s886_s8 = int_to_ptr.vmem [resolvable:$true] %s61_s8 }
  0x27   :  { %s731_s13 = scalar_lea.hbm %s987_s3, 2048 }
  0x28   :  { %p732_p2 = scmp.ne.s32.totalorder %s987_s3, %s731_s13  ;;  %p735_p3 = scmp.lt.u32.totalorder %s731_s13, %s987_s3 }
  0x2a   :  { %p737_p4 = pnand %p735_p3, %p732_p2 }
  0x2c   :  { %740 = shalt.err (!%p737_p4)
}
  0x2d   :  { %s741_s0 = scalar_lea.vmem %s48_s29, 2048  ;;  %p746_p6 = scmp.lt.s32.totalorder %s48_s29, %s48_s29 }
  0x2e   :  { %p742_p5 = scmp.ne.s32.totalorder %s48_s29, %s741_s0  ;;  %p747_p7 = scmp.lt.s32.totalorder %s741_s0, %s741_s0 }
  0x30   :  { %p748_p8 = por %p747_p7, %p746_p6 }
  0x32   :  { %p749_p9 = pnand %p748_p8, %p742_p5 }
  0x34   :  { %752 = shalt.err (!%p749_p9)
}
  0x35   :  { %53 = dma.hbm_to_vmem [thread:$0]  %s987_s3, 2048, %s48_s29, [#allocation6], %s806_s11, %s806_s11, %s807_s12  }
  0x36   :  { %s753_s22 = scalar_lea.hbm %s989_s5, 1024 }
  0x37   :  { %p754_p10 = scmp.ne.s32.totalorder %s989_s5, %s753_s22  ;;  %p757_p11 = scmp.lt.u32.totalorder %s753_s22, %s989_s5 }
  0x39   :  { %p759_p12 = pnand %p757_p11, %p754_p10 }
  0x3b   :  { %762 = shalt.err (!%p759_p12)
}
  0x3c   :  { %s763_s28 = scalar_lea.vmem %s886_s8, 1024  ;;  %p768_p0 = scmp.lt.s32.totalorder %s886_s8, %s886_s8 }
  0x3d   :  { %p764_p13 = scmp.ne.s32.totalorder %s886_s8, %s763_s28  ;;  %p769_p1 = scmp.lt.s32.totalorder %s763_s28, %s763_s28 }
  0x3f   :  { %p770_p2 = por %p769_p1, %p768_p0 }
  0x41   :  { %p771_p3 = pnand %p770_p2, %p764_p13 }
  0x43   :  { %774 = shalt.err (!%p771_p3)
}
  0x44   :  { %67 = dma.hbm_to_vmem [thread:$0]  %s989_s5, 1024, %s886_s8, [#allocation9], %s806_s11, %s806_s11, %s807_s12  }
  0x45   :  { %797 = dma.done.wait [#allocation3], 256  }
  0x46   :  { %798 = vsyncadd [#allocation3], 4294967040 }
  0x47   :  { %799 = dma.done.wait [#allocation6], 2304  }
  0x48   :  { %800 = vsyncadd [#allocation6], 4294964992 }
  0x49   :  { %801 = dma.done.wait [#allocation9], 1024  }
  0x4a   :  { %802 = vsyncadd [#allocation9], 4294966272  ;;  %v813_v0 = vmov 0.0   ;;  %vm814_vm0 = vmmov 0   ;;  %v661_v1 = vld [vmem:[#allocation5] sm:$0xff]   ;;  %v662_v2 = vld [vmem:[#allocation5 + $0x8] sm:$0xff]  }
  0x4b   :  { %582 = vmatprep.subr.bf16.mxu0 %v813_v0  ;;  %586 = vmatprep.mubr.msk.bf16.mxu0 %vm814_vm0, %v813_v0  ;;  %v87_v3 = vld [vmem:[#allocation2] sm:$0xff]  ;;  %v88_v4 = vld [vmem:[#allocation2 + $0x8] sm:$0xff]  ;;  %vm112_vm1 = vcmask 261120   ;;  %v665_v8 = vld [vmem:[#allocation7 + $0x10] sm:$0xff]   ;;  %s815_s13 = smov [#allocation10]  }
  0x4c   :  { %590 = vmatprep.subr.bf16.mxu1 %v813_v0  ;;  %606 = vmatprep.mubr.msk.bf16.mxu1 %vm814_vm0, %v813_v0  ;;  %v663_v5 = vld [vmem:[#allocation7] sm:$0xff]   ;;  %v89_v6 = vpack.c.bf16 %v88_v4, %v87_v3  ;;  %v664_v7 = vld [vmem:[#allocation7 + $0x8] sm:$0xff]   ;;  %v666_v9 = vld [vmem:[#allocation7 + $0x18] sm:$0xff]   ;;  %s507_s14 = sshll.u32 %s815_s13, 4  ;;  %s508_s14 = int_to_ptr.vmem [resolvable:$true] %s507_s14 }
  0x4d   :  { %583 = vmatpush3.bf16.msra.mxu0 %v661_v1  ;;  %591 = vmatpush3.bf16.msra.mxu1 %v663_v5  ;;  %v667_v10 = vld [vmem:[#allocation7 + $0x20] sm:$0xff]   ;;  %v668_v11 = vld [vmem:[#allocation7 + $0x28] sm:$0xff]   ;;  %v669_v12 = vld [vmem:[#allocation7 + $0x30] sm:$0xff]   ;;  %p780_p5 = scmp.lt.s32.totalorder %s508_s14, %s508_s14 }
  0x4e   :  { %584 = vmatprep.subr.bf16.mxu0 %v813_v0  ;;  %592 = vmatprep.subr.bf16.mxu1 %v813_v0  ;;  %v670_v13 = vld [vmem:[#allocation7 + $0x38] sm:$0xff]   ;;  %v671_v14 = vld [vmem:[#allocation7 + $0x40] sm:$0xff]   ;;  %v672_v15 = vld [vmem:[#allocation7 + $0x48] sm:$0xff]  }
  0x4f   :  { %v673_v16 = vld [vmem:[#allocation7 + $0x50] sm:$0xff]   ;;  %v674_v17 = vld [vmem:[#allocation7 + $0x58] sm:$0xff]   ;;  %v675_v18 = vld [vmem:[#allocation7 + $0x60] sm:$0xff]  }
  0x50   :  { %v676_v19 = vld [vmem:[#allocation7 + $0x68] sm:$0xff]   ;;  %v521_v20 = vld [vmem:[%s986_s2] ss:$0 sm:$0xff]  ;;  %v677_v30 = vld [vmem:[#allocation7 + $0x70] sm:$0xff]  }
  0x51   :  { %585 = vmatpush3.bf16.msra.mxu0 %v662_v2  ;;  %593 = vmatpush3.bf16.msra.mxu1 %v664_v7  ;;  %v678_v31 = vld [vmem:[#allocation7 + $0x78] sm:$0xff]   ;;  %v679_v32 = vld [vmem:[#allocation8] sm:$0xff]   ;;  %v680_v33 = vld [vmem:[#allocation8 + $0x8] sm:$0xff]  }
  0x52   :  { %610 = vmatprep.subr.bf16.mxu0 %v813_v0  ;;  %594 = vmatprep.subr.bf16.mxu1 %v813_v0  ;;  %v681_v34 = vld [vmem:[#allocation8 + $0x10] sm:$0xff]   ;;  %v682_v35 = vld [vmem:[#allocation8 + $0x18] sm:$0xff]   ;;  %v683_v36 = vld [vmem:[#allocation8 + $0x20] sm:$0xff]  }
  0x53   :  { %v684_v37 = vld [vmem:[#allocation8 + $0x28] sm:$0xff]   ;;  %v525_v38 = vld [vmem:[%s988_s4] ss:$0 sm:$0xff]  ;;  %v685_v48 = vld [vmem:[#allocation8 + $0x30] sm:$0xff]  }
  0x54   :  { %587 = vmatmul.mubr.msk.bf16.vlgmr.msra.gmra.mrb[0].mxu0 %vm112_vm1, %v89_v6  ;;  %v686_v49 = vld [vmem:[#allocation8 + $0x38] sm:$0xff]   ;;  %v534_v50 = vld [vmem:[%s988_s4 + $0x1] ss:$0 sm:$0xff]  ;;  %v543_v60 = vld [vmem:[%s990_s6] ss:$0 sm:$0xff]  ;;  %s775_s4 = scalar_lea.vmem %s508_s14, 256 }
  0x55   :  { %626 = vmatprep.mubr.msk.bf16.mxu0 %vm814_vm0, %v813_v0  ;;  %595 = vmatpush3.bf16.msra.mxu1 %v665_v8  ;;  %p776_p4 = scmp.ne.s32.totalorder %s508_s14, %s775_s4  ;;  %p781_p6 = scmp.lt.s32.totalorder %s775_s4, %s775_s4 }
  0x56   :  { %596 = vmatprep.subr.bf16.mxu1 %v813_v0  ;;  %611 = vmatpush3.bf16.msra.mxu0 %v671_v14 }
  0x57   :  { %612 = vmatprep.subr.bf16.mxu0 %v813_v0  ;;  %p782_p7 = por %p781_p6, %p780_p5 }
  0x59   :  { %597 = vmatpush3.bf16.msra.mxu1 %v666_v9  ;;  %p783_p8 = pnand %p782_p7, %p776_p4 }
  0x5a   :  { %598 = vmatprep.subr.bf16.mxu1 %v813_v0  ;;  %613 = vmatpush3.bf16.msra.mxu0 %v672_v15 }
  0x5b   :  { %614 = vmatprep.subr.bf16.mxu0 %v813_v0 }
  0x5d   :  { %599 = vmatpush3.bf16.msra.mxu1 %v667_v10 }
  0x5e   :  { %600 = vmatprep.subr.bf16.mxu1 %v813_v0  ;;  %615 = vmatpush3.bf16.msra.mxu0 %v673_v16 }
  0x5f   :  { %616 = vmatprep.subr.bf16.mxu0 %v813_v0 }
  0x61   :  { %601 = vmatpush3.bf16.msra.mxu1 %v668_v11 }
  0x62   :  { %602 = vmatprep.subr.bf16.mxu1 %v813_v0  ;;  %617 = vmatpush3.bf16.msra.mxu0 %v674_v17 }
  0x63   :  { %618 = vmatprep.subr.bf16.mxu0 %v813_v0 }
  0x65   :  { %603 = vmatpush3.bf16.msra.mxu1 %v669_v12 }
  0x66   :  { %604 = vmatprep.subr.bf16.mxu1 %v813_v0  ;;  %619 = vmatpush3.bf16.msra.mxu0 %v675_v18 }
  0x67   :  { %620 = vmatprep.subr.bf16.mxu0 %v813_v0 }
  0x69   :  { %605 = vmatpush3.bf16.msra.mxu1 %v670_v13 }
  0x6a   :  { %630 = vmatprep.subr.bf16.mxu1 %v813_v0  ;;  %621 = vmatpush3.bf16.msra.mxu0 %v676_v19 }
  0x6b   :  { %622 = vmatprep.subr.bf16.mxu0 %v813_v0 }
  0x6e   :  { %623 = vmatpush3.bf16.msra.mxu0 %v677_v30 }
  0x6f   :  { %624 = vmatprep.subr.bf16.mxu0 %v813_v0 }
  0x72   :  { %625 = vmatpush3.bf16.msra.mxu0 %v678_v31 }
 0x127   :  { %v150_v21 = vpop.f32.mrb[0].mxu0 }
 0x128   :  { %v151_v22 = vadd.f32 %v521_v20, %v150_v21  ;;  %v588_v23 = vpop.f32.mrb[1].mxu0 }
 0x129   :  { %v153_v24 = vpop.f32.mrb[2].mxu0 }
 0x12a   :  { %v154_v25 = vadd.f32 %v521_v20, %v153_v24  ;;  %v589_v26 = vpop.f32.mrb[3].mxu0  ;;  %v157_v27 = vmax.f32 %v151_v22, 0.0 }
 0x12c   :  { %v158_v28 = vmax.f32 %v154_v25, 0.0 }
 0x12e   :  { %v159_v29 = vpack.c.bf16 %v158_v28, %v157_v27 }
 0x130   :  { %607 = vmatmul.mubr.bf16.vlgmr.msra.gmra.mrb[0].mxu1 %v159_v29 }
 0x131   :  { %646 = vmatprep.mubr.msk.bf16.mxu1 %vm814_vm0, %v813_v0  ;;  %631 = vmatpush3.bf16.msra.mxu1 %v679_v32 }
 0x132   :  { %632 = vmatprep.subr.bf16.mxu1 %v813_v0 }
 0x135   :  { %633 = vmatpush3.bf16.msra.mxu1 %v680_v33 }
 0x136   :  { %634 = vmatprep.subr.bf16.mxu1 %v813_v0 }
 0x139   :  { %635 = vmatpush3.bf16.msra.mxu1 %v681_v34 }
 0x13a   :  { %636 = vmatprep.subr.bf16.mxu1 %v813_v0 }
 0x13d   :  { %637 = vmatpush3.bf16.msra.mxu1 %v682_v35 }
 0x13e   :  { %638 = vmatprep.subr.bf16.mxu1 %v813_v0 }
 0x141   :  { %639 = vmatpush3.bf16.msra.mxu1 %v683_v36 }
 0x142   :  { %640 = vmatprep.subr.bf16.mxu1 %v813_v0 }
 0x145   :  { %641 = vmatpush3.bf16.msra.mxu1 %v684_v37 }
 0x146   :  { %642 = vmatprep.subr.bf16.mxu1 %v813_v0 }
 0x149   :  { %643 = vmatpush3.bf16.msra.mxu1 %v685_v48 }
 0x14a   :  { %644 = vmatprep.subr.bf16.mxu1 %v813_v0 }
 0x14d   :  { %645 = vmatpush3.bf16.msra.mxu1 %v686_v49 }
 0x203   :  { %v264_v39 = vpop.f32.mrb[0].mxu1 }
 0x204   :  { %v265_v40 = vadd.f32 %v525_v38, %v264_v39  ;;  %v608_v41 = vpop.f32.mrb[1].mxu1 }
 0x205   :  { %v267_v42 = vpop.f32.mrb[2].mxu1 }
 0x206   :  { %v268_v43 = vadd.f32 %v525_v38, %v267_v42  ;;  %v609_v44 = vpop.f32.mrb[3].mxu1  ;;  %v271_v45 = vmax.f32 %v265_v40, 0.0 }
 0x208   :  { %v272_v46 = vmax.f32 %v268_v43, 0.0 }
 0x20a   :  { %v273_v47 = vpack.c.bf16 %v272_v46, %v271_v45 }
 0x20c   :  { %627 = vmatmul.mubr.bf16.vlgmr.msra.gmra.mrb[4].mxu0 %v273_v47 }
 0x2df   :  { %v379_v51 = vpop.f32.mrb[4].mxu0 }
 0x2e0   :  { %v380_v52 = vadd.f32 %v534_v50, %v379_v51  ;;  %v628_v53 = vpop.f32.mrb[5].mxu0 }
 0x2e1   :  { %v382_v54 = vpop.f32.mrb[6].mxu0 }
 0x2e2   :  { %v383_v55 = vadd.f32 %v534_v50, %v382_v54  ;;  %v629_v56 = vpop.f32.mrb[7].mxu0  ;;  %v386_v57 = vmax.f32 %v380_v52, 0.0 }
 0x2e4   :  { %v387_v58 = vmax.f32 %v383_v55, 0.0 }
 0x2e6   :  { %v388_v59 = vpack.c.bf16 %v387_v58, %v386_v57 }
 0x2e8   :  { %647 = vmatmul.mubr.bf16.vlgmr.msra.gmra.mrb[4].mxu1 %v388_v59 }
 0x3bb   :  { %v493_v61 = vpop.f32.mrb[4].mxu1 }
 0x3bc   :  { %v494_v62 = vadd.f32 %v543_v60, %v493_v61  ;;  %v648_v63 = vpop.f32.mrb[5].mxu1 }
 0x3bd   :  { %v496_v0 = vpop.f32.mrb[6].mxu1 }
 0x3be   :  { %500 = vst [vmem:[#allocation10] sm:$0xff] %v494_v62  ;;  %v497_v1 = vadd.f32 %v543_v60, %v496_v0  ;;  %v649_v2 = vpop.f32.mrb[7].mxu1 }
 0x3c0   :  { %501 = vst [vmem:[#allocation10 + $0x8] sm:$0xff] %v497_v1 }
 0x3c1   :  { %786 = shalt.err (!%p783_p8)
}
 0x3c2   :  { %s787_s17 = scalar_lea.hbm %s991_s7, 256 }
 0x3c3   :  { %p788_p9 = scmp.ne.s32.totalorder %s991_s7, %s787_s17  ;;  %p791_p10 = scmp.lt.u32.totalorder %s787_s17, %s991_s7 }
 0x3c5   :  { %p793_p11 = pnand %p791_p10, %p788_p9 }
 0x3c7   :  { %796 = shalt.err (!%p793_p11)
}
 0x3c8   :  { %513 = dma.vmem_to_hbm [thread:$0]  %s508_s14, 256, %s991_s7, [#allocation4], %s809_s1, %s809_s1, %s810_s25  }
 0x3c9   :  { %803 = dma.done.wait [#allocation4], 256  }
 0x3ca   :  { %804 = vsyncadd [#allocation4], 4294967040 }
 0x3cb   :  { %517 = vsyncpa [#allocation3], 1 }
 0x3cc   :  { %518 = vsyncpa [#allocation6], 1 }
 0x3cd   :  { %519 = vsyncpa [#allocation9], 1 }
 0x3ce   :  { %520 = vsyncpa [#allocation4], 1 }

</bundles_post_ra>
